<compile_context>
chip_gen: v7x
topology: tpu7x:2x2x1
jax: 0.10.0
libtpu: 0.0.40
codegen_flags: <defaults>
</compile_context>

<pallas_src>
import functools

import jax
import jax.numpy as jnp
from jax.experimental import pallas as pl
from jax.experimental.pallas import tpu as pltpu

_VMEM_LIMIT = 32 * 1024 * 1024  # safe on v5e/v6e (128 MiB) and v7x (64 MiB)


# ---------------------------------------------------------------------------
# Fused two-layer kernel: small graphs, everything VMEM-resident, one launch.
# ---------------------------------------------------------------------------
def _gcn_fused_kernel(a_ref, x_ref, rin_ref, rout_ref,
                      w1_ref, b1_ref, w2_ref, b2_ref, o_ref, *,
                      pre1: bool, pre2: bool):
    a = a_ref[...]                      # (N, N) bf16, 0/1 entries -> exact
    rin = rin_ref[...]                  # (N, 1) f32, D_in^-1/2 (dst nodes)
    rout = rout_ref[...]                # (N, 1) f32, D_out^-1/2 (src nodes)

    def layer(feat, w_ref, b_ref, pre, relu):
        w = w_ref[...].astype(jnp.bfloat16)
        fs = feat * rout                              # diag scale of A's columns
        if pre:                                       # in_feats > out_feats
            fs = jnp.dot(fs.astype(jnp.bfloat16), w,
                         preferred_element_type=jnp.float32)
        agg = jnp.dot(a, fs.astype(jnp.bfloat16),
                      preferred_element_type=jnp.float32) * rin
        if not pre:                                   # in_feats <= out_feats
            agg = jnp.dot(agg.astype(jnp.bfloat16), w,
                          preferred_element_type=jnp.float32)
        rst = agg + b_ref[...]
        return jnp.maximum(rst, 0.0) if relu else rst

    h = layer(x_ref[...], w1_ref, b1_ref, pre1, True)         # conv1 + th.relu
    o_ref[...] = layer(h, w2_ref, b2_ref, pre2, False).astype(o_ref.dtype)


def _gcn_fused(a_bf16, x, rin, rout, w1, b1, w2, b2):
    n = a_bf16.shape[0]
    kernel = functools.partial(_gcn_fused_kernel,
                               pre1=w1.shape[0] > w1.shape[1],
                               pre2=w2.shape[0] > w2.shape[1])
    return pl.pallas_call(
        kernel,
        out_shape=jax.ShapeDtypeStruct((n, w2.shape[1]), jnp.float32),
        compiler_params=pltpu.CompilerParams(vmem_limit_bytes=_VMEM_LIMIT),
    )(a_bf16, x, rin, rout, w1, b1.reshape(1, -1), w2, b2.reshape(1, -1))


# ---------------------------------------------------------------------------
# Tiled path (large graphs): dense transform kernel + tiled aggregation kernel
# ---------------------------------------------------------------------------
def _transform_kernel(x_ref, w_ref, o_ref):
    # feat1 = X @ W  (row-tiled; used when in_feats > out_feats so the
    # aggregation runs on the narrower feature dim).
    o_ref[...] = jnp.dot(x_ref[...].astype(jnp.bfloat16),
                         w_ref[...].astype(jnp.bfloat16),
                         preferred_element_type=jnp.float32)


def _dense_transform(x, w, *, tile):
    n, fin = x.shape
    fout = w.shape[1]
    return pl.pallas_call(
        _transform_kernel,
        out_shape=jax.ShapeDtypeStruct((n, fout), jnp.float32),
        grid=(n // tile,),
        in_specs=[pl.BlockSpec((tile, fin), lambda i: (i, 0)),
                  pl.BlockSpec((fin, fout), lambda i: (0, 0))],
        out_specs=pl.BlockSpec((tile, fout), lambda i: (i, 0)),
        compiler_params=pltpu.CompilerParams(
            dimension_semantics=("parallel",),
            vmem_limit_bytes=_VMEM_LIMIT),
    )(x, w)


def _agg_kernel(*refs, post_transform: bool, apply_relu: bool):
    # Tiled aggregation: acc[i] += A[i, k] @ (D_out^-1/2 * feat)[k]
    # Epilogue (last k): row-scale by D_in^-1/2, optional @ W, bias, ReLU.
    if post_transform:
        a_ref, feat_ref, rout_ref, rin_ref, w_ref, b_ref, o_ref, acc_ref = refs
    else:
        a_ref, feat_ref, rout_ref, rin_ref, b_ref, o_ref, acc_ref = refs
        w_ref = None

    k = pl.program_id(1)

    @pl.when(k == 0)
    def _():
        acc_ref[...] = jnp.zeros_like(acc_ref)

    fs = (feat_ref[...] * rout_ref[...]).astype(jnp.bfloat16)   # (TK, F)
    acc_ref[...] += jnp.dot(a_ref[...], fs,                     # A tile is bf16
                            preferred_element_type=jnp.float32)

    @pl.when(k == pl.num_programs(1) - 1)
    def _():
        rst = acc_ref[...] * rin_ref[...]                       # D_in^-1/2
        if post_transform:
            rst = jnp.dot(rst.astype(jnp.bfloat16),
                          w_ref[...].astype(jnp.bfloat16),
                          preferred_element_type=jnp.float32)
        rst = rst + b_ref[...]
        if apply_relu:
            rst = jnp.maximum(rst, 0.0)
        o_ref[...] = rst.astype(o_ref.dtype)


def _pick_tile(n, target):
    return target if n % target == 0 else n


def gcn_layer_tiled(a_bf16, x, w, b, rin, rout, *, apply_relu, tile=256):
    n = a_bf16.shape[0]
    fin, fout = w.shape
    pre = fin > fout
    tm = _pick_tile(n, tile)
    tk = _pick_tile(n, tile)

    if pre:
        feat = _dense_transform(x, w, tile=tm)   # (N, fout), narrow aggregation
        f_agg = fout
    else:
        feat = x
        f_agg = fin

    kernel = functools.partial(_agg_kernel, post_transform=not pre,
                               apply_relu=apply_relu)

    in_specs = [
        pl.BlockSpec((tm, tk), lambda i, k: (i, k)),       # A tile (bf16)
        pl.BlockSpec((tk, f_agg), lambda i, k: (k, 0)),    # source features
        pl.BlockSpec((tk, 1), lambda i, k: (k, 0)),        # D_out^-1/2 (sources)
        pl.BlockSpec((tm, 1), lambda i, k: (i, 0)),        # D_in^-1/2  (dests)
    ]
    args = [a_bf16, feat, rout, rin]
    if not pre:
        in_specs.append(pl.BlockSpec((fin, fout), lambda i, k: (0, 0)))
        args.append(w)
    in_specs.append(pl.BlockSpec((1, fout), lambda i, k: (0, 0)))
    args.append(b.reshape(1, fout))

    return pl.pallas_call(
        kernel,
        out_shape=jax.ShapeDtypeStruct((n, fout), jnp.float32),
        grid=(n // tm, n // tk),
        in_specs=in_specs,
        out_specs=pl.BlockSpec((tm, fout), lambda i, k: (i, 0)),
        scratch_shapes=[pltpu.VMEM((tm, f_agg), jnp.float32)],
        compiler_params=pltpu.CompilerParams(
            dimension_semantics=("parallel", "arbitrary"),
            vmem_limit_bytes=_VMEM_LIMIT),
    )(*args)


# ---------------------------------------------------------------------------
# Forward pass
# ---------------------------------------------------------------------------
def _degree_rsqrt(a):
    # One-time O(N^2) reduction shared by both layers ("both" norm, degrees
    # clamped to >= 1, i.e. allow_zero_in_degree semantics).
    in_deg = jnp.sum(a, axis=1, keepdims=True)            # (N, 1) dst in-degree
    out_deg = jnp.sum(a, axis=0, keepdims=True).T         # (N, 1) src out-degree
    return (jax.lax.rsqrt(jnp.maximum(in_deg, 1.0)),
            jax.lax.rsqrt(jnp.maximum(out_deg, 1.0)))


def gcn_forward(a, x, w1, b1, w2, b2, *, fuse_threshold=256, tile=256):
    """GCN.forward: h = relu(conv1(g, x)); out = conv2(g, h)."""
    a = a.astype(jnp.float32)
    rin, rout = _degree_rsqrt(a)
    a_bf16 = a.astype(jnp.bfloat16)   # 0/1 adjacency -> exact in bf16
    n = a.shape[0]

    if n <= fuse_threshold:
        # Both layers in one pallas_call: h stays in VMEM, single launch.
        return _gcn_fused(a_bf16, x, rin, rout, w1, b1, w2, b2)

    h = gcn_layer_tiled(a_bf16, x, w1, b1, rin, rout,
                        apply_relu=True, tile=tile)          # conv1 + th.relu
    return gcn_layer_tiled(a_bf16, h, w2, b2, rin, rout,
                           apply_relu=False, tile=tile)      # conv2


def gcn_reference(a, x, w1, b1, w2, b2):
    """Pure-jnp f32 reference mirroring DGL GraphConv 'both' normalization."""
    a = a.astype(jnp.float32)
    in_deg = jnp.maximum(jnp.sum(a, axis=1, keepdims=True), 1.0)
    out_deg = jnp.maximum(jnp.sum(a, axis=0, keepdims=True), 1.0)
    a_norm = a * jax.lax.rsqrt(in_deg) * jax.lax.rsqrt(out_deg)
    h = jnp.maximum(a_norm @ (x @ w1) + b1, 0.0)
    return a_norm @ (h @ w2) + b2


def _glorot_uniform(key, fan_in, fan_out):
    limit = jnp.sqrt(6.0 / (fan_in + fan_out))
    return jax.random.uniform(key, (fan_in, fan_out), jnp.float32, -limit, limit)


if __name__ == "__main__":
    key = jax.random.PRNGKey(0)

    def make_problem(k, n, fin, hid, ncls, p):
        k_adj, k_x, k_w1, k_w2 = jax.random.split(k, 4)
        adj = (jax.random.uniform(k_adj, (n, n)) < p).astype(jnp.float32)
        adj = jnp.maximum(adj, jnp.eye(n, dtype=jnp.float32))  # self-loops
        x = jax.random.normal(k_x, (n, fin), jnp.float32)
        w1 = _glorot_uniform(k_w1, fin, hid)
        b1 = jnp.zeros((hid,), jnp.float32)
        w2 = _glorot_uniform(k_w2, hid, ncls)
        b2 = jnp.zeros((ncls,), jnp.float32)
        return adj, x, w1, b1, w2, b2

    k_small, k_big = jax.random.split(key)

    # Small graph (module's natural scale) -> fused single-launch kernel.
    small = make_problem(k_small, 16, 8, 32, 4, 0.3)
    out_s = gcn_forward(*small)
    jax.block_until_ready(out_s)
    assert out_s.shape == (16, 4)
    assert jnp.allclose(out_s, gcn_reference(*small), atol=2e-2, rtol=5e-2)

    # Larger graph -> tiled (rows-parallel x k-arbitrary) per-layer kernels.
    big = make_problem(k_big, 512, 8, 32, 4, 0.05)
    out_b = gcn_forward(*big)
    jax.block_until_ready(out_b)
    assert out_b.shape == (512, 4)
    assert jnp.allclose(out_b, gcn_reference(*big), atol=2e-2, rtol=5e-2)

    print("KERNEL_OK")
</pallas_src>

<mosaic_0001>
module attributes {stable_mosaic.version = 11 : i64} {
  func.func @_gcn_fused_kernel(%arg0: memref<16x16xbf16, #tpu.memory_space<vmem>>, %arg1: memref<16x8xf32, #tpu.memory_space<vmem>>, %arg2: memref<16x1xf32, #tpu.memory_space<vmem>>, %arg3: memref<16x1xf32, #tpu.memory_space<vmem>>, %arg4: memref<8x32xf32, #tpu.memory_space<vmem>>, %arg5: memref<1x32xf32, #tpu.memory_space<vmem>>, %arg6: memref<32x4xf32, #tpu.memory_space<vmem>>, %arg7: memref<1x4xf32, #tpu.memory_space<vmem>>, %arg8: memref<16x4xf32, #tpu.memory_space<vmem>>) attributes {dimension_semantics = [], scalar_prefetch = 0 : i64, scratch_operands = 0 : i64, tpu.core_type = #tpu.core_type<tc>} {
    %c0 = arith.constant 0 : index
    %c0_0 = arith.constant 0 : index
    %0 = vector.load %arg0[%c0, %c0_0] : memref<16x16xbf16, #tpu.memory_space<vmem>>, vector<16x16xbf16>
    %c0_1 = arith.constant 0 : index
    %c0_2 = arith.constant 0 : index
    %1 = vector.load %arg2[%c0_1, %c0_2] : memref<16x1xf32, #tpu.memory_space<vmem>>, vector<16x1xf32>
    %c0_3 = arith.constant 0 : index
    %c0_4 = arith.constant 0 : index
    %2 = vector.load %arg3[%c0_3, %c0_4] : memref<16x1xf32, #tpu.memory_space<vmem>>, vector<16x1xf32>
    %c0_5 = arith.constant 0 : index
    %c0_6 = arith.constant 0 : index
    %3 = vector.load %arg1[%c0_5, %c0_6] : memref<16x8xf32, #tpu.memory_space<vmem>>, vector<16x8xf32>
    %c0_7 = arith.constant 0 : index
    %c0_8 = arith.constant 0 : index
    %4 = vector.load %arg4[%c0_7, %c0_8] : memref<8x32xf32, #tpu.memory_space<vmem>>, vector<8x32xf32>
    %5 = arith.truncf %4 : vector<8x32xf32> to vector<8x32xbf16>
    %6 = vector.broadcast %2 : vector<16x1xf32> to vector<16x8xf32>
    %7 = arith.mulf %3, %6 : vector<16x8xf32>
    %8 = arith.truncf %7 : vector<16x8xf32> to vector<16x8xbf16>
    %cst = arith.constant dense<0.000000e+00> : vector<16x8xf32>
    %9 = tpu.matmul %0, %8, %cst {dimension_numbers = #tpu.dot_dimension_numbers<[1], [0], [0], [1], [0, 0, 1, 1], [], []>} : vector<16x16xbf16>, vector<16x8xbf16>, vector<16x8xf32> -> vector<16x8xf32>
    %10 = vector.broadcast %1 : vector<16x1xf32> to vector<16x8xf32>
    %11 = arith.mulf %9, %10 : vector<16x8xf32>
    %12 = arith.truncf %11 : vector<16x8xf32> to vector<16x8xbf16>
    %cst_9 = arith.constant dense<0.000000e+00> : vector<16x32xf32>
    %13 = tpu.matmul %12, %5, %cst_9 {dimension_numbers = #tpu.dot_dimension_numbers<[1], [0], [0], [1], [0, 0, 1, 1], [], []>} : vector<16x8xbf16>, vector<8x32xbf16>, vector<16x32xf32> -> vector<16x32xf32>
    %c0_10 = arith.constant 0 : index
    %c0_11 = arith.constant 0 : index
    %14 = vector.load %arg5[%c0_10, %c0_11] : memref<1x32xf32, #tpu.memory_space<vmem>>, vector<1x32xf32>
    %15 = vector.broadcast %14 : vector<1x32xf32> to vector<16x32xf32>
    %16 = arith.addf %13, %15 : vector<16x32xf32>
    %cst_12 = arith.constant 0.000000e+00 : f32
    %17 = vector.broadcast %cst_12 : f32 to vector<16x32xf32>
    %18 = arith.maximumf %16, %17 : vector<16x32xf32>
    %c0_13 = arith.constant 0 : index
    %c0_14 = arith.constant 0 : index
    %19 = vector.load %arg6[%c0_13, %c0_14] : memref<32x4xf32, #tpu.memory_space<vmem>>, vector<32x4xf32>
    %20 = arith.truncf %19 : vector<32x4xf32> to vector<32x4xbf16>
    %21 = vector.broadcast %2 : vector<16x1xf32> to vector<16x32xf32>
    %22 = arith.mulf %18, %21 : vector<16x32xf32>
    %23 = arith.truncf %22 : vector<16x32xf32> to vector<16x32xbf16>
    %cst_15 = arith.constant dense<0.000000e+00> : vector<16x4xf32>
    %24 = tpu.matmul %23, %20, %cst_15 {dimension_numbers = #tpu.dot_dimension_numbers<[1], [0], [0], [1], [0, 0, 1, 1], [], []>} : vector<16x32xbf16>, vector<32x4xbf16>, vector<16x4xf32> -> vector<16x4xf32>
    %25 = arith.truncf %24 : vector<16x4xf32> to vector<16x4xbf16>
    %cst_16 = arith.constant dense<0.000000e+00> : vector<16x4xf32>
    %26 = tpu.matmul %0, %25, %cst_16 {dimension_numbers = #tpu.dot_dimension_numbers<[1], [0], [0], [1], [0, 0, 1, 1], [], []>} : vector<16x16xbf16>, vector<16x4xbf16>, vector<16x4xf32> -> vector<16x4xf32>
    %27 = vector.broadcast %1 : vector<16x1xf32> to vector<16x4xf32>
    %28 = arith.mulf %26, %27 : vector<16x4xf32>
    %c0_17 = arith.constant 0 : index
    %c0_18 = arith.constant 0 : index
    %29 = vector.load %arg7[%c0_17, %c0_18] : memref<1x4xf32, #tpu.memory_space<vmem>>, vector<1x4xf32>
    %30 = vector.broadcast %29 : vector<1x4xf32> to vector<16x4xf32>
    %31 = arith.addf %28, %30 : vector<16x4xf32>
    %c0_19 = arith.constant 0 : index
    %c0_20 = arith.constant 0 : index
    %32 = vector.load %arg8[%c0_19, %c0_20] : memref<16x4xf32, #tpu.memory_space<vmem>>, vector<16x4xf32>
    tpu.vector_store %arg8[%c0_19, %c0_20], %31 {strides = array<i32>} : memref<16x4xf32, #tpu.memory_space<vmem>>, vector<16x4xf32>,
    return
  }
}

</mosaic_0001>

<bundles_post_ra>
// kernel: tpu_custom_call.1
= control target key start
LH: loop header
LB: loop body
LE: loop exit
PB: predicated region body
PF: predicated region fallthrough
CT: control target
= control target key end

     0   :  { %v336_v0 = vmov 0   ;;  %v337_v3 = vmov 0.0   ;;  %vm338_vm0 = vmmov 0   ;;  %vm58_vm1 = vcmask 130048   ;;  %s438_s3 = inlined_call_operand.vmem [shape: f32[16,1], index: 3, kind: input, shape index: {}]   ;;  %s439_s0 = inlined_call_operand.vmem [shape: bf16[16,16], index: 0, kind: input, shape index: {}]   ;;  %s440_s2 = inlined_call_operand.vmem [shape: f32[16,1], index: 2, kind: input, shape index: {}]   ;;  %s441_s1 = inlined_call_operand.vmem [shape: f32[16,8], index: 1, kind: input, shape index: {}]   ;;  %s442_s4 = inlined_call_operand.vmem [shape: f32[8,32], index: 4, kind: input, shape index: {}]   ;;  %s443_s6 = inlined_call_operand.vmem [shape: f32[32,4], index: 6, kind: input, shape index: {}]   ;;  %s444_s5 = inlined_call_operand.vmem [shape: f32[1,32], index: 5, kind: input, shape index: {}]   ;;  %s445_s7 = inlined_call_operand.vmem [shape: f32[1,4], index: 7, kind: input, shape index: {}]   ;;  %s446_s8 = inlined_call_operand.vmem [shape: f32[16,4], index: 8, kind: output, shape index: {}]  }
   0x1   :  { %333 = vset.pattern.permute.xlu0 %v336_v0  ;;  %v34_v1 = vld [vmem:[%s438_s3] sm:$0xff]  ;;  %334 = vset.pattern.permute.xlu1 %v336_v0  ;;  %v35_v2 = vld [vmem:[%s438_s3 + $0x8] sm:$0xff]  ;;  %vm127_vm2 = vcmask 1043456   ;;  %vm123_vm3 = vcmask 64512   ;;  %v176_v29 = vld [vmem:[%s443_s6 + $0x10] sm:$0xff]  ;;  %vm183_vm4 = vcmask 261120  }
   0x2   :  { %42 = vperm.xlu0 %333, %v34_v1   ;;  %304 = vmatprep.subr.bf16.mxu0 %v337_v3  ;;  %v32_v4 = vld [vmem:[%s440_s2] sm:$0xff]  ;;  %v33_v5 = vld [vmem:[%s440_s2 + $0x8] sm:$0xff]  ;;  %v177_v30 = vld [vmem:[%s443_s6 + $0x18] sm:$0xff]  ;;  %vm281_vm5 = vcmask 31744  }
   0x3   :  { %310 = vmatprep.subr.bf16.mxu1 %v337_v3  ;;  %306 = vmatprep.mubr.msk.bf16.mxu0 %vm338_vm0, %v337_v3  ;;  %v36_v7 = vld [vmem:[%s441_s1] sm:$0xff]  ;;  %v37_v8 = vld [vmem:[%s441_s1 + $0x8] sm:$0xff]  ;;  %v179_v31 = vpack.c.bf16 %v177_v30, %v176_v29 }
   0x4   :  { %312 = vmatprep.mubr.msk.bf16.mxu1 %vm338_vm0, %v337_v3  ;;  %105 = vperm.xlu1 %334, %v32_v4   ;;  %v335_v13 = vld [vmem:[%s439_s0] sm:$0xff]   ;;  %v175_v27 = vld [vmem:[%s443_s6 + $0x8] sm:$0xff] }
   0x5   :  { %v38_v14 = vld [vmem:[%s442_s4] sm:$0xff] }
   0x6   :  { %47 = vperm.xlu0 %333, %v35_v2   ;;  %v39_v15 = vpack.c.bf16 %v38_v14, %v38_v14  ;;  %v174_v26 = vld [vmem:[%s443_s6] sm:$0xff] }
   0x7   :  { %v178_v28 = vpack.c.bf16 %v175_v27, %v174_v26  ;;  %v290_v32 = vld [vmem:[%s444_s5] ss:$0 sm:$0xff] }
   0x8   :  { %110 = vperm.xlu1 %334, %v33_v5   ;;  %v129_v16 = vsel %vm127_vm2, %v39_v15, 0  ;;  %v294_v50 = vld [vmem:[%s445_s7] ss:$0 sm:$0xff] }
   0x9   :  { %311 = vmatpush3.bf16.msra.mxu1 %v129_v16 }
   0xa   :  { %324 = vmatprep.subr.bf16.mxu1 %v337_v3 }
  0x81   :  { %v43_v6 = vpop.permute.xlu0 %42 }
  0x82   :  { %v50_v10 = vmul.f32 %v43_v6, %v36_v7 }
  0x83   :  { %v106_v17 = vpop.permute.xlu1 %105 }
  0x85   :  { %v48_v9 = vpop.permute.xlu0 %47 }
  0x86   :  { %v51_v11 = vmul.f32 %v48_v9, %v37_v8 }
  0x87   :  { %v111_v20 = vpop.permute.xlu1 %110 }
  0x88   :  { %v52_v12 = vpack.c.bf16 %v51_v11, %v50_v10 }
  0x8a   :  { %305 = vmatpush3.bf16.msra.mxu0 %v52_v12 }
  0x8b   :  { %316 = vmatprep.subr.bf16.mxu0 %v337_v3 }
  0x8d   :  { %307 = vmatmul.mubr.msk.bf16.vlgmr.msra.gmra.mrb[0].mxu0 %vm58_vm1, %v335_v13 }
  0x8e   :  { %320 = vmatprep.mubr.msk.bf16.mxu0 %vm338_vm0, %v337_v3  ;;  %317 = vmatpush3.bf16.msra.mxu0 %v178_v28 }
  0x8f   :  { %318 = vmatprep.subr.bf16.mxu0 %v337_v3 }
  0x92   :  { %319 = vmatpush3.bf16.msra.mxu0 %v179_v31 }
 0x160   :  { %v96_v18 = vpop.f32.mrb[0].mxu0 }
 0x161   :  { %v308_v19 = vpop.f32.mrb[1].mxu0  ;;  %v113_v22 = vmul.f32 %v106_v17, %v96_v18 }
 0x162   :  { %v99_v21 = vpop.f32.mrb[2].mxu0 }
 0x163   :  { %v114_v23 = vmul.f32 %v111_v20, %v99_v21  ;;  %v309_v24 = vpop.f32.mrb[3].mxu0 }
 0x165   :  { %v115_v25 = vpack.c.bf16 %v114_v23, %v113_v22 }
 0x167   :  { %313 = vmatmul.mubr.msk.bf16.vlgmr.msra.gmra.mrb[0].mxu1 %vm123_vm3, %v115_v25 }
 0x168   :  { %326 = vmatprep.mubr.msk.bf16.mxu1 %vm338_vm0, %v337_v3 }
 0x23a   :  { %v165_v33 = vpop.f32.mrb[0].mxu1 }
 0x23b   :  { %v166_v34 = vadd.f32 %v290_v32, %v165_v33  ;;  %v314_v35 = vpop.f32.mrb[1].mxu1 }
 0x23c   :  { %v168_v36 = vpop.f32.mrb[2].mxu1 }
 0x23d   :  { %v172_v37 = vmax.f32 %v166_v34, 0.0  ;;  %v169_v38 = vadd.f32 %v290_v32, %v168_v36  ;;  %v315_v39 = vpop.f32.mrb[3].mxu1 }
 0x23f   :  { %v173_v40 = vmax.f32 %v169_v38, 0.0  ;;  %v180_v41 = vmul.f32 %v172_v37, %v43_v6 }
 0x241   :  { %v181_v42 = vmul.f32 %v173_v40, %v48_v9 }
 0x243   :  { %v182_v43 = vpack.c.bf16 %v181_v42, %v180_v41 }
 0x245   :  { %321 = vmatmul.mubr.msk.bf16.vlgmr.msra.gmra.mrb[4].mxu0 %vm183_vm4, %v182_v43 }
 0x318   :  { %v221_v44 = vpop.f32.mrb[4].mxu0 }
 0x319   :  { %v322_v45 = vpop.f32.mrb[5].mxu0 }
 0x31a   :  { %v224_v46 = vpop.f32.mrb[6].mxu0 }
 0x31b   :  { %v228_v47 = vpack.c.bf16 %v224_v46, %v221_v44  ;;  %v323_v48 = vpop.f32.mrb[7].mxu0 }
 0x31d   :  { %325 = vmatpush3.bf16.msra.mxu1 %v228_v47 }
 0x320   :  { %327 = vmatmul.mubr.msk.bf16.vlgmr.msra.gmra.mrb[4].mxu1 %vm58_vm1, %v335_v13 }
 0x3f3   :  { %v263_v49 = vpop.f32.mrb[4].mxu1 }
 0x3f4   :  { %v270_v51 = vmul.f32 %v263_v49, %v106_v17  ;;  %v328_v52 = vpop.f32.mrb[5].mxu1 }
 0x3f5   :  { %v266_v53 = vpop.f32.mrb[6].mxu1 }
 0x3f6   :  { %v279_v54 = vadd.f32 %v294_v50, %v270_v51  ;;  %v271_v55 = vmul.f32 %v266_v53, %v111_v20  ;;  %v329_v56 = vpop.f32.mrb[7].mxu1 }
 0x3f8   :  { %282 = vst.msk [vmem:[%s446_s8] sm:$0xff] %vm281_vm5, %v279_v54  ;;  %v280_v57 = vadd.f32 %v294_v50, %v271_v55 }
 0x3fa   :  { %283 = vst.msk [vmem:[%s446_s8 + $0x8] sm:$0xff] %vm281_vm5, %v280_v57 }

</bundles_post_ra>
